<compile_context>
chip_gen: v6e
topology: v6e:2x2x1
jax: 0.10.0
libtpu: 0.0.40
codegen_flags: <defaults>
</compile_context>

<pallas_src>
import functools
import math

import jax
import jax.numpy as jnp
from jax.experimental import pallas as pl
from jax.experimental.pallas import tpu as pltpu

LOG_SIG_MAX = 2.0
LOG_SIG_MIN = -20.0
_HALF_LOG_2PI = 0.5 * math.log(2.0 * math.pi)
_LOG2 = math.log(2.0)


def _round_up(x, m):
    return ((x + m - 1) // m) * m


def _actor_kernel(state_ref, eps_ref, w1_ref, w2_ref, wh_ref, vec_ref, out_ref,
                  *, hidden_dim, action_dim, action_pad):
    H, A, Ap = hidden_dim, action_dim, action_pad

    # Packed per-feature row vectors: one DMA instead of six tiny ones.
    b1 = vec_ref[0:1, :H]
    b2 = vec_ref[1:2, :H]
    bh = vec_ref[2:3, :2 * Ap]
    scale = vec_ref[3:4, :Ap]
    bias = vec_ref[4:5, :Ap]

    x = state_ref[...]                                      # (TB, Spad) f32
    eps = eps_ref[...]                                      # (TB, Ap)  f32

    # hidden layers: bf16 MXU inputs, f32 accumulate, f32 elementwise
    h = jnp.dot(x.astype(jnp.bfloat16), w1_ref[...],
                preferred_element_type=jnp.float32) + b1
    h = jnp.maximum(h, 0.0)
    h = jnp.dot(h.astype(jnp.bfloat16), w2_ref[...],
                preferred_element_type=jnp.float32) + b2
    h = jnp.maximum(h, 0.0)

    # merged mean / log_std head: one MXU matmul, vreg-aligned 128-lane halves
    head = jnp.dot(h.astype(jnp.bfloat16), wh_ref[...],
                   preferred_element_type=jnp.float32) + bh
    mu = head[:, :Ap]
    log_std = jnp.clip(head[:, Ap:2 * Ap], LOG_SIG_MIN, LOG_SIG_MAX)
    std = jnp.exp(log_std)

    # rsample
    a_raw = mu + std * eps

    # One exp serves both softplus(-2a) and tanh(a); stable for any sign/magnitude:
    #   e = exp(-2|a|) in (0, 1]
    #   softplus(-2a) = max(-2a, 0) + log1p(e)
    #   tanh(a)       = sign(a) * (1 - e) / (1 + e)
    e = jnp.exp(-2.0 * jnp.abs(a_raw))
    log1pe = jnp.log1p(e)
    softplus_neg2a = jnp.maximum(-2.0 * a_raw, 0.0) + log1pe
    tanh_a = jnp.where(a_raw >= 0.0, 1.0, -1.0) * (1.0 - e) / (1.0 + e)

    # Normal(mu, std).log_prob(a_raw) minus the reference's tanh log-det term,
    # per lane; padded lanes masked out before the single cross-lane reduction.
    logp_lane = (-0.5 * eps * eps - log_std - _HALF_LOG_2PI
                 - 2.0 * (_LOG2 - a_raw - softplus_neg2a))
    lane = jax.lax.broadcasted_iota(jnp.int32, logp_lane.shape, 1)
    logp = jnp.sum(jnp.where(lane < A, logp_lane, 0.0), axis=1, keepdims=True)

    tb = x.shape[0]
    # Fused lane-dense output slab: [0:Ap) sample, [Ap:2Ap) mean, [2Ap:2Ap+128) logp.
    out_ref[:, 0:Ap] = tanh_a * scale + bias
    out_ref[:, Ap:2 * Ap] = jnp.tanh(mu) * scale + bias
    out_ref[:, 2 * Ap:2 * Ap + 128] = jnp.broadcast_to(logp, (tb, 128))


def actor_forward(state, params, key, *, block_batch=512):
    """state: (B, S) float32.  key: jax PRNG key for the reparameterized sample.

    Returns (sample_action (B,A), log_prob (B,1), mean_action (B,A)).
    """
    B, S = state.shape
    Spad, H = params["w1"].shape
    Ap = params["wh"].shape[1] // 2
    A = params["action_dim"]
    W = params["vec"].shape[1]
    OUT_W = 2 * Ap + 128

    # Lane-align the streamed state block (512B-aligned DMA rows).
    if S < Spad:
        state = jnp.pad(state, ((0, 0), (0, Spad - S)))

    # Standard-normal noise, lane-padded to Ap (padded lanes are masked in-kernel).
    eps = jax.random.normal(key, (B, Ap), jnp.float32)

    # Batch tile: multiple of 8 sublanes, >= 2 grid steps for larger batches so
    # ("parallel",) shards across both v7x TensorCores; large tiles on v5e/v6e.
    if B <= 8:
        TB = B
    else:
        TB = min(block_batch, max(8, _round_up(pl.cdiv(B, 2), 8)))
        TB = min(TB, B)
    grid = (pl.cdiv(B, TB),)

    kernel = functools.partial(_actor_kernel, hidden_dim=H, action_dim=A,
                               action_pad=Ap)

    cost = pl.CostEstimate(
        flops=2 * B * (Spad * H + H * H + H * 2 * Ap),
        transcendentals=4 * B * Ap,
        bytes_accessed=(4 * B * (Spad + Ap + OUT_W)
                        + 2 * (Spad * H + H * H + H * 2 * Ap)
                        + 4 * 5 * W),
    )

    slab = pl.pallas_call(
        kernel,
        grid=grid,
        in_specs=[
            pl.BlockSpec((TB, Spad), lambda i: (i, 0)),      # state: streamed
            pl.BlockSpec((TB, Ap), lambda i: (i, 0)),        # eps: streamed
            pl.BlockSpec((Spad, H), lambda i: (0, 0)),       # weights: resident
            pl.BlockSpec((H, H), lambda i: (0, 0)),
            pl.BlockSpec((H, 2 * Ap), lambda i: (0, 0)),     # merged padded head
            pl.BlockSpec((5, W), lambda i: (0, 0)),          # packed biases/scale
        ],
        out_specs=pl.BlockSpec((TB, OUT_W), lambda i: (i, 0)),
        out_shape=jax.ShapeDtypeStruct((B, OUT_W), jnp.float32),
        compiler_params=pltpu.CompilerParams(
            dimension_semantics=("parallel",)),
        cost_estimate=cost,
    )(state, eps, params["w1"], params["w2"], params["wh"], params["vec"])

    sample_action = slab[:, :A]
    mean_action = slab[:, Ap:Ap + A]
    log_prob = slab[:, 2 * Ap:2 * Ap + 1]
    return sample_action, log_prob, mean_action


def init_params(key, state_dim, hidden_dim, action_dim, action_high, action_low):
    """Parameter init mirroring the PyTorch module (xavier hidden, default heads).

    Weights stored transposed (in, out) in bf16, state/head dims lane-padded,
    and every per-feature row vector packed into a single f32 (5, W) slab.
    """
    ks = jax.random.split(key, 8)
    Spad = _round_up(state_dim, 128)
    Ap = _round_up(action_dim, 128)

    def xavier(k, fan_in, fan_out):
        bound = math.sqrt(6.0 / (fan_in + fan_out))
        return jax.random.uniform(k, (fan_in, fan_out), jnp.float32, -bound, bound)

    def default_linear(kw, kb, fan_in, fan_out):
        bound = 1.0 / math.sqrt(fan_in)
        w = jax.random.uniform(kw, (fan_in, fan_out), jnp.float32, -bound, bound)
        b = jax.random.uniform(kb, (fan_out,), jnp.float32, -bound, bound)
        return w, b

    w1 = xavier(ks[0], state_dim, hidden_dim)
    w1 = jnp.zeros((Spad, hidden_dim), jnp.float32).at[:state_dim, :].set(w1)
    b1 = jax.random.uniform(ks[1], (hidden_dim,), jnp.float32, -0.003, 0.003)
    w2 = xavier(ks[2], hidden_dim, hidden_dim)
    b2 = jax.random.uniform(ks[3], (hidden_dim,), jnp.float32, -0.003, 0.003)
    wm, bm = default_linear(ks[4], ks[5], hidden_dim, action_dim)
    wls, bls = default_linear(ks[6], ks[7], hidden_dim, action_dim)

    # Merged, lane-padded head: columns [0:A) = mean, [Ap:Ap+A) = log_std.
    wh = jnp.zeros((hidden_dim, 2 * Ap), jnp.float32)
    wh = wh.at[:, :action_dim].set(wm)
    wh = wh.at[:, Ap:Ap + action_dim].set(wls)
    bh = jnp.zeros((2 * Ap,), jnp.float32)
    bh = bh.at[:action_dim].set(bm).at[Ap:Ap + action_dim].set(bls)

    action_scale = ((action_high - action_low) / 2.0).reshape(-1).astype(jnp.float32)
    action_bias = ((action_high + action_low) / 2.0).reshape(-1).astype(jnp.float32)

    # Pack every per-feature row vector into one (5, W) slab -> a single DMA.
    W = max(_round_up(hidden_dim, 128), 2 * Ap)
    vec = jnp.zeros((5, W), jnp.float32)
    vec = vec.at[0, :hidden_dim].set(b1)
    vec = vec.at[1, :hidden_dim].set(b2)
    vec = vec.at[2, :2 * Ap].set(bh)
    vec = vec.at[3, :action_dim].set(action_scale)
    vec = vec.at[4, :action_dim].set(action_bias)

    return dict(
        w1=w1.astype(jnp.bfloat16),
        w2=w2.astype(jnp.bfloat16),
        wh=wh.astype(jnp.bfloat16),
        vec=vec,
        action_dim=action_dim,
    )


if __name__ == "__main__":
    batch = 2
    state_dim = 8
    hidden_dim = 128        # PyTorch module default
    action_dim = 4

    key = jax.random.PRNGKey(0)
    k_state, k_params, k_eps = jax.random.split(key, 3)

    # Synthetic Box action space: high = +2, low = -2.
    action_high = jnp.full((action_dim,), 2.0, jnp.float32)
    action_low = jnp.full((action_dim,), -2.0, jnp.float32)

    params = init_params(k_params, state_dim, hidden_dim, action_dim,
                         action_high, action_low)

    state = jax.random.normal(k_state, (batch, state_dim), jnp.float32)

    sample_action, log_prob, mean_action = jax.block_until_ready(
        actor_forward(state, params, k_eps))

    assert sample_action.shape == (batch, action_dim)
    assert log_prob.shape == (batch, 1)
    assert mean_action.shape == (batch, action_dim)
    assert bool(jnp.all(jnp.isfinite(sample_action)))
    assert bool(jnp.all(jnp.isfinite(log_prob)))
    assert bool(jnp.all(jnp.isfinite(mean_action)))
    # tanh-squashed actions must lie inside the scaled action box.
    assert bool(jnp.all(jnp.abs(sample_action) <= 2.0 + 1e-5))
    assert bool(jnp.all(jnp.abs(mean_action) <= 2.0 + 1e-5))

    # ---- pure-JAX reference (same eps, same bf16 matmul precision) ----
    Spad = params["w1"].shape[0]
    Ap = params["wh"].shape[1] // 2
    vec = params["vec"]
    b1r = vec[0, :hidden_dim]
    b2r = vec[1, :hidden_dim]
    bhr = vec[2, :2 * Ap]
    scale_r = vec[3, :action_dim]
    bias_r = vec[4, :action_dim]

    state_p = jnp.pad(state, ((0, 0), (0, Spad - state_dim)))
    h = jnp.maximum(jnp.dot(state_p.astype(jnp.bfloat16), params["w1"],
                            preferred_element_type=jnp.float32) + b1r, 0.0)
    h = jnp.maximum(jnp.dot(h.astype(jnp.bfloat16), params["w2"],
                            preferred_element_type=jnp.float32) + b2r, 0.0)
    head = jnp.dot(h.astype(jnp.bfloat16), params["wh"],
                   preferred_element_type=jnp.float32) + bhr
    mu_ref = head[:, :action_dim]
    log_std_ref = jnp.clip(head[:, Ap:Ap + action_dim], LOG_SIG_MIN, LOG_SIG_MAX)
    std_ref = jnp.exp(log_std_ref)
    eps_ref = jax.random.normal(k_eps, (batch, Ap), jnp.float32)[:, :action_dim]
    a_raw_ref = mu_ref + std_ref * eps_ref
    logp_ref = jnp.sum(-0.5 * eps_ref * eps_ref - log_std_ref - _HALF_LOG_2PI,
                       axis=1, keepdims=True)
    minus_ref = 2.0 * (_LOG2 - a_raw_ref - jnp.logaddexp(-2.0 * a_raw_ref, 0.0))
    logp_ref = logp_ref - jnp.sum(minus_ref, axis=1, keepdims=True)
    sample_ref = jnp.tanh(a_raw_ref) * scale_r + bias_r
    mean_ref = jnp.tanh(mu_ref) * scale_r + bias_r

    assert bool(jnp.allclose(sample_action, sample_ref, atol=1e-2, rtol=1e-2))
    assert bool(jnp.allclose(mean_action, mean_ref, atol=1e-2, rtol=1e-2))
    assert bool(jnp.allclose(log_prob, logp_ref, atol=1e-2, rtol=1e-2))

    print("KERNEL_OK")
</pallas_src>

<mosaic_0001>
module attributes {stable_mosaic.version = 11 : i64} {
  func.func @_actor_kernel(%arg0: i32, %arg1: memref<2x128xf32, #tpu.memory_space<vmem>>, %arg2: memref<2x128xf32, #tpu.memory_space<vmem>>, %arg3: memref<128x128xbf16, #tpu.memory_space<vmem>>, %arg4: memref<128x128xbf16, #tpu.memory_space<vmem>>, %arg5: memref<128x256xbf16, #tpu.memory_space<vmem>>, %arg6: memref<5x256xf32, #tpu.memory_space<vmem>>, %arg7: memref<2x384xf32, #tpu.memory_space<vmem>>) attributes {dimension_semantics = [#tpu.dimension_semantics<parallel>], iteration_bounds = array<i64: 1>, scalar_prefetch = 0 : i64, scratch_operands = 0 : i64, tpu.core_type = #tpu.core_type<tc>, window_params = [{transform_indices = @transform_0, window_bounds = array<i64: 2, 128>}, {transform_indices = @transform_1, window_bounds = array<i64: 2, 128>}, {pipeline_mode = #tpu.pipeline_mode<synchronous>, transform_indices = @transform_2, window_bounds = array<i64: 128, 128>}, {pipeline_mode = #tpu.pipeline_mode<synchronous>, transform_indices = @transform_3, window_bounds = array<i64: 128, 128>}, {pipeline_mode = #tpu.pipeline_mode<synchronous>, transform_indices = @transform_4, window_bounds = array<i64: 128, 256>}, {pipeline_mode = #tpu.pipeline_mode<synchronous>, transform_indices = @transform_5, window_bounds = array<i64: 5, 256>}, {transform_indices = @transform_6, window_bounds = array<i64: 2, 384>}]} {
    %c0 = arith.constant 0 : index
    %c0_0 = arith.constant 0 : index
    %0 = vector.load %arg6[%c0, %c0_0] : memref<5x256xf32, #tpu.memory_space<vmem>>, vector<1x128xf32>
    %c1 = arith.constant 1 : index
    %c0_1 = arith.constant 0 : index
    %1 = vector.load %arg6[%c1, %c0_1] : memref<5x256xf32, #tpu.memory_space<vmem>>, vector<1x128xf32>
    %c2 = arith.constant 2 : index
    %c0_2 = arith.constant 0 : index
    %2 = vector.load %arg6[%c2, %c0_2] : memref<5x256xf32, #tpu.memory_space<vmem>>, vector<1x256xf32>
    %c3 = arith.constant 3 : index
    %c0_3 = arith.constant 0 : index
    %3 = vector.load %arg6[%c3, %c0_3] : memref<5x256xf32, #tpu.memory_space<vmem>>, vector<1x128xf32>
    %c4 = arith.constant 4 : index
    %c0_4 = arith.constant 0 : index
    %4 = vector.load %arg6[%c4, %c0_4] : memref<5x256xf32, #tpu.memory_space<vmem>>, vector<1x128xf32>
    %c0_5 = arith.constant 0 : index
    %c0_6 = arith.constant 0 : index
    %5 = vector.load %arg1[%c0_5, %c0_6] : memref<2x128xf32, #tpu.memory_space<vmem>>, vector<2x128xf32>
    %c0_7 = arith.constant 0 : index
    %c0_8 = arith.constant 0 : index
    %6 = vector.load %arg2[%c0_7, %c0_8] : memref<2x128xf32, #tpu.memory_space<vmem>>, vector<2x128xf32>
    %7 = arith.truncf %5 : vector<2x128xf32> to vector<2x128xbf16>
    %c0_9 = arith.constant 0 : index
    %c0_10 = arith.constant 0 : index
    %8 = vector.load %arg3[%c0_9, %c0_10] : memref<128x128xbf16, #tpu.memory_space<vmem>>, vector<128x128xbf16>
    %cst = arith.constant dense<0.000000e+00> : vector<2x128xf32>
    %9 = tpu.matmul %7, %8, %cst {dimension_numbers = #tpu.dot_dimension_numbers<[1], [0], [0], [1], [0, 0, 1, 1], [], []>} : vector<2x128xbf16>, vector<128x128xbf16>, vector<2x128xf32> -> vector<2x128xf32>
    %10 = vector.broadcast %0 : vector<1x128xf32> to vector<2x128xf32>
    %11 = arith.addf %9, %10 : vector<2x128xf32>
    %cst_11 = arith.constant 0.000000e+00 : f32
    %12 = vector.broadcast %cst_11 : f32 to vector<2x128xf32>
    %13 = arith.maximumf %11, %12 : vector<2x128xf32>
    %14 = arith.truncf %13 : vector<2x128xf32> to vector<2x128xbf16>
    %c0_12 = arith.constant 0 : index
    %c0_13 = arith.constant 0 : index
    %15 = vector.load %arg4[%c0_12, %c0_13] : memref<128x128xbf16, #tpu.memory_space<vmem>>, vector<128x128xbf16>
    %cst_14 = arith.constant dense<0.000000e+00> : vector<2x128xf32>
    %16 = tpu.matmul %14, %15, %cst_14 {dimension_numbers = #tpu.dot_dimension_numbers<[1], [0], [0], [1], [0, 0, 1, 1], [], []>} : vector<2x128xbf16>, vector<128x128xbf16>, vector<2x128xf32> -> vector<2x128xf32>
    %17 = vector.broadcast %1 : vector<1x128xf32> to vector<2x128xf32>
    %18 = arith.addf %16, %17 : vector<2x128xf32>
    %cst_15 = arith.constant 0.000000e+00 : f32
    %19 = vector.broadcast %cst_15 : f32 to vector<2x128xf32>
    %20 = arith.maximumf %18, %19 : vector<2x128xf32>
    %21 = arith.truncf %20 : vector<2x128xf32> to vector<2x128xbf16>
    %c0_16 = arith.constant 0 : index
    %c0_17 = arith.constant 0 : index
    %22 = vector.load %arg5[%c0_16, %c0_17] : memref<128x256xbf16, #tpu.memory_space<vmem>>, vector<128x256xbf16>
    %cst_18 = arith.constant dense<0.000000e+00> : vector<2x256xf32>
    %23 = tpu.matmul %21, %22, %cst_18 {dimension_numbers = #tpu.dot_dimension_numbers<[1], [0], [0], [1], [0, 0, 1, 1], [], []>} : vector<2x128xbf16>, vector<128x256xbf16>, vector<2x256xf32> -> vector<2x256xf32>
    %24 = vector.broadcast %2 : vector<1x256xf32> to vector<2x256xf32>
    %25 = arith.addf %23, %24 : vector<2x256xf32>
    %26 = vector.extract_strided_slice %25 {offsets = [0, 0], sizes = [2, 128], strides = [1, 1]} : vector<2x256xf32> to vector<2x128xf32>
    %27 = vector.extract_strided_slice %25 {offsets = [0, 128], sizes = [2, 128], strides = [1, 1]} : vector<2x256xf32> to vector<2x128xf32>
    %cst_19 = arith.constant -2.000000e+01 : f32
    %cst_20 = arith.constant 2.000000e+00 : f32
    %28 = vector.broadcast %cst_19 : f32 to vector<2x128xf32>
    %29 = arith.maximumf %28, %27 : vector<2x128xf32>
    %30 = vector.broadcast %cst_20 : f32 to vector<2x128xf32>
    %31 = arith.minimumf %30, %29 : vector<2x128xf32>
    %32 = math.exp %31 : vector<2x128xf32>
    %33 = arith.mulf %32, %6 : vector<2x128xf32>
    %34 = arith.addf %26, %33 : vector<2x128xf32>
    %35 = math.absf %34 : vector<2x128xf32>
    %cst_21 = arith.constant -2.000000e+00 : f32
    %36 = vector.broadcast %cst_21 : f32 to vector<2x128xf32>
    %37 = arith.mulf %36, %35 : vector<2x128xf32>
    %38 = math.exp %37 : vector<2x128xf32>
    %39 = math.log1p %38 : vector<2x128xf32>
    %cst_22 = arith.constant -2.000000e+00 : f32
    %40 = vector.broadcast %cst_22 : f32 to vector<2x128xf32>
    %41 = arith.mulf %40, %34 : vector<2x128xf32>
    %cst_23 = arith.constant 0.000000e+00 : f32
    %42 = vector.broadcast %cst_23 : f32 to vector<2x128xf32>
    %43 = arith.maximumf %41, %42 : vector<2x128xf32>
    %44 = arith.addf %43, %39 : vector<2x128xf32>
    %cst_24 = arith.constant 0.000000e+00 : f32
    %45 = vector.broadcast %cst_24 : f32 to vector<2x128xf32>
    %46 = arith.cmpf oge, %34, %45 : vector<2x128xf32>
    %cst_25 = arith.constant 1.000000e+00 : f32
    %cst_26 = arith.constant -1.000000e+00 : f32
    %47 = vector.broadcast %cst_25 : f32 to vector<2x128xf32>
    %48 = vector.broadcast %cst_26 : f32 to vector<2x128xf32>
    %49 = arith.select %46, %47, %48 : vector<2x128xi1>, vector<2x128xf32>
    %cst_27 = arith.constant 1.000000e+00 : f32
    %50 = vector.broadcast %cst_27 : f32 to vector<2x128xf32>
    %51 = arith.subf %50, %38 : vector<2x128xf32>
    %52 = arith.mulf %49, %51 : vector<2x128xf32>
    %cst_28 = arith.constant 1.000000e+00 : f32
    %53 = vector.broadcast %cst_28 : f32 to vector<2x128xf32>
    %54 = arith.addf %53, %38 : vector<2x128xf32>
    %55 = arith.divf %52, %54 : vector<2x128xf32>
    %cst_29 = arith.constant -5.000000e-01 : f32
    %56 = vector.broadcast %cst_29 : f32 to vector<2x128xf32>
    %57 = arith.mulf %56, %6 : vector<2x128xf32>
    %58 = arith.mulf %57, %6 : vector<2x128xf32>
    %59 = arith.subf %58, %31 : vector<2x128xf32>
    %cst_30 = arith.constant 0.918938517 : f32
    %60 = vector.broadcast %cst_30 : f32 to vector<2x128xf32>
    %61 = arith.subf %59, %60 : vector<2x128xf32>
    %cst_31 = arith.constant 0.693147182 : f32
    %62 = vector.broadcast %cst_31 : f32 to vector<2x128xf32>
    %63 = arith.subf %62, %34 : vector<2x128xf32>
    %64 = arith.subf %63, %44 : vector<2x128xf32>
    %cst_32 = arith.constant 2.000000e+00 : f32
    %65 = vector.broadcast %cst_32 : f32 to vector<2x128xf32>
    %66 = arith.mulf %65, %64 : vector<2x128xf32>
    %67 = arith.subf %61, %66 : vector<2x128xf32>
    %68 = tpu.iota {dimensions = array<i32: 1>} : vector<2x128xi32>
    %c4_i32 = arith.constant 4 : i32
    %69 = vector.broadcast %c4_i32 : i32 to vector<2x128xi32>
    %70 = arith.cmpi slt, %68, %69 : vector<2x128xi32>
    %cst_33 = arith.constant 0.000000e+00 : f32
    %71 = vector.broadcast %cst_33 : f32 to vector<2x128xf32>
    %72 = arith.select %70, %67, %71 : vector<2x128xi1>, vector<2x128xf32>
    %cst_34 = arith.constant dense<0.000000e+00> : vector<2xf32>
    %73 = vector.multi_reduction <add>, %72, %cst_34 [1] : vector<2x128xf32> to vector<2xf32>
    %74 = vector.shape_cast %73 : vector<2xf32> to vector<2x1xf32>
    %75 = vector.broadcast %3 : vector<1x128xf32> to vector<2x128xf32>
    %76 = arith.mulf %55, %75 : vector<2x128xf32>
    %77 = vector.broadcast %4 : vector<1x128xf32> to vector<2x128xf32>
    %78 = arith.addf %76, %77 : vector<2x128xf32>
    %c0_35 = arith.constant 0 : index
    %c0_36 = arith.constant 0 : index
    %79 = vector.load %arg7[%c0_35, %c0_36] : memref<2x384xf32, #tpu.memory_space<vmem>>, vector<2x128xf32>
    tpu.vector_store %arg7[%c0_35, %c0_36], %78 {strides = array<i32>} : memref<2x384xf32, #tpu.memory_space<vmem>>, vector<2x128xf32>,
    %80 = math.tanh %26 : vector<2x128xf32>
    %81 = vector.broadcast %3 : vector<1x128xf32> to vector<2x128xf32>
    %82 = arith.mulf %80, %81 : vector<2x128xf32>
    %83 = vector.broadcast %4 : vector<1x128xf32> to vector<2x128xf32>
    %84 = arith.addf %82, %83 : vector<2x128xf32>
    %c0_37 = arith.constant 0 : index
    %c128 = arith.constant 128 : index
    %85 = vector.load %arg7[%c0_37, %c128] : memref<2x384xf32, #tpu.memory_space<vmem>>, vector<2x128xf32>
    tpu.vector_store %arg7[%c0_37, %c128], %84 {strides = array<i32>} : memref<2x384xf32, #tpu.memory_space<vmem>>, vector<2x128xf32>,
    %86 = vector.shape_cast %74 : vector<2x1xf32> to vector<2x1xf32>
    %87 = vector.broadcast %86 : vector<2x1xf32> to vector<2x128xf32>
    %c0_38 = arith.constant 0 : index
    %c256 = arith.constant 256 : index
    %88 = vector.load %arg7[%c0_38, %c256] : memref<2x384xf32, #tpu.memory_space<vmem>>, vector<2x128xf32>
    tpu.vector_store %arg7[%c0_38, %c256], %87 {strides = array<i32>} : memref<2x384xf32, #tpu.memory_space<vmem>>, vector<2x128xf32>,
    return
  }
  func.func @transform_0(%arg0: i32) -> (i32, i32) {
    %c0_i32 = arith.constant 0 : i32
    %c0_i32_0 = arith.constant 0 : i32
    return %arg0, %c0_i32 : i32, i32
  }
  func.func @transform_1(%arg0: i32) -> (i32, i32) {
    %c0_i32 = arith.constant 0 : i32
    %c0_i32_0 = arith.constant 0 : i32
    return %arg0, %c0_i32 : i32, i32
  }
  func.func @transform_2(%arg0: i32) -> (i32, i32) {
    %c0_i32 = arith.constant 0 : i32
    %c0_i32_0 = arith.constant 0 : i32
    %c0_i32_1 = arith.constant 0 : i32
    return %c0_i32, %c0_i32_0 : i32, i32
  }
  func.func @transform_3(%arg0: i32) -> (i32, i32) {
    %c0_i32 = arith.constant 0 : i32
    %c0_i32_0 = arith.constant 0 : i32
    %c0_i32_1 = arith.constant 0 : i32
    return %c0_i32, %c0_i32_0 : i32, i32
  }
  func.func @transform_4(%arg0: i32) -> (i32, i32) {
    %c0_i32 = arith.constant 0 : i32
    %c0_i32_0 = arith.constant 0 : i32
    %c0_i32_1 = arith.constant 0 : i32
    return %c0_i32, %c0_i32_0 : i32, i32
  }
  func.func @transform_5(%arg0: i32) -> (i32, i32) {
    %c0_i32 = arith.constant 0 : i32
    %c0_i32_0 = arith.constant 0 : i32
    %c0_i32_1 = arith.constant 0 : i32
    return %c0_i32, %c0_i32_0 : i32, i32
  }
  func.func @transform_6(%arg0: i32) -> (i32, i32) {
    %c0_i32 = arith.constant 0 : i32
    %c0_i32_0 = arith.constant 0 : i32
    return %arg0, %c0_i32 : i32, i32
  }
}

</mosaic_0001>

<bundles_post_ra>
// kernel: tpu_custom_call.1
= control target key start
LH: loop header
LB: loop body
LE: loop exit
PB: predicated region body
PF: predicated region fallthrough
CT: control target
= control target key end

     0   :  { %11 = vsyncpa [#allocation3], 0  ;;  %s918_s0 = inlined_call_operand.hbm [shape: f32[2,128], index: 0, kind: input, shape index: {}]   ;;  %s919_s1 = inlined_call_operand.hbm [shape: f32[2,128], index: 1, kind: input, shape index: {}]   ;;  %s920_s2 = inlined_call_operand.hbm [shape: bf16[128,128], index: 2, kind: input, shape index: {}]   ;;  %s921_s3 = inlined_call_operand.hbm [shape: bf16[128,128], index: 3, kind: input, shape index: {}]   ;;  %s922_s4 = inlined_call_operand.hbm [shape: bf16[128,256], index: 4, kind: input, shape index: {}]   ;;  %s923_s5 = inlined_call_operand.hbm [shape: f32[5,256], index: 5, kind: input, shape index: {}]   ;;  %s924_s6 = inlined_call_operand.hbm [shape: f32[2,384], index: 6, kind: output, shape index: {}]  }
   0x1   :  { %12 = vsyncpa [#allocation6], 0 }
   0x2   :  { %13 = vsyncpa [#allocation9], 0 }
   0x3   :  { %14 = vsyncpa [#allocation12], 0 }
   0x4   :  { %15 = vsyncpa [#allocation4], 0  ;;  %s847_s21 = smov [#allocation5]  }
   0x5   :  { %s32_s22 = sshll.u32 %s847_s21, 4  ;;  %s33_s22 = int_to_ptr.vmem [resolvable:$true] %s32_s22 }
   0x6   :  { %s705_s23 = scalar_lea.vmem %s33_s22, 32  ;;  %p710_p1 = scmp.lt.s32.totalorder %s33_s22, %s33_s22 }
   0x7   :  { %p706_p0 = scmp.ne.s32.totalorder %s33_s22, %s705_s23  ;;  %p711_p2 = scmp.lt.s32.totalorder %s705_s23, %s705_s23 }
   0x9   :  { %p712_p3 = por %p711_p2, %p710_p1 }
   0xb   :  { %p713_p4 = pnand %p712_p3, %p706_p0 }
   0xd   :  { %716 = shalt.err (!%p713_p4)
}
   0xe   :  { %35 = dma.hbm_to_vmem [thread:$0]  %s919_s1, 32, %s33_s22, [#allocation6]  }
   0xf   :  { %s848_s26 = smov [#allocation8]   ;;  %s849_s28 = smov [#allocation2]  }
  0x10   :  { %s53_s27 = sshll.u32 %s848_s26, 4  ;;  %s22_s29 = sshll.u32 %s849_s28, 4  ;;  %s54_s27 = int_to_ptr.vmem [resolvable:$true] %s53_s27  ;;  %s23_s29 = int_to_ptr.vmem [resolvable:$true] %s22_s29 }
  0x11   :  { %s725_s30 = scalar_lea.vmem %s54_s27, 1024  ;;  %p730_p6 = scmp.lt.s32.totalorder %s54_s27, %s54_s27 }
  0x12   :  { %p726_p5 = scmp.ne.s32.totalorder %s54_s27, %s725_s30  ;;  %p731_p7 = scmp.lt.s32.totalorder %s725_s30, %s725_s30 }
  0x14   :  { %p732_p8 = por %p731_p7, %p730_p6 }
  0x16   :  { %p733_p9 = pnand %p732_p8, %p726_p5 }
  0x18   :  { %736 = shalt.err (!%p733_p9)
}
  0x19   :  { %s850_s7 = smov 64   ;;  %s851_s8 = smov 4  }
  0x1a   :  { %59 = dma.hbm_to_vmem [thread:$0]  %s921_s3, 1024, %s54_s27, [#allocation9], %s850_s7, %s850_s7, %s851_s8  }
  0x1b   :  { %s745_s1 = scalar_lea.vmem %s23_s29, 32  ;;  %p750_p11 = scmp.lt.s32.totalorder %s23_s29, %s23_s29 }
  0x1c   :  { %p746_p10 = scmp.ne.s32.totalorder %s23_s29, %s745_s1  ;;  %p751_p12 = scmp.lt.s32.totalorder %s745_s1, %s745_s1 }
  0x1e   :  { %p752_p13 = por %p751_p12, %p750_p11 }
  0x20   :  { %p753_p0 = pnand %p752_p13, %p746_p10 }
  0x22   :  { %756 = shalt.err (!%p753_p0)
}
  0x23   :  { %25 = dma.hbm_to_vmem [thread:$0]  %s918_s0, 32, %s23_s29, [#allocation3]  }
  0x24   :  { %s852_s13 = smov [#allocation7]   ;;  %s853_s15 = smov [#allocation10]  }
  0x25   :  { %s41_s14 = sshll.u32 %s852_s13, 4  ;;  %s65_s16 = sshll.u32 %s853_s15, 4  ;;  %s42_s14 = int_to_ptr.vmem [resolvable:$true] %s41_s14  ;;  %s66_s16 = int_to_ptr.vmem [resolvable:$true] %s65_s16 }
  0x26   :  { %s765_s17 = scalar_lea.vmem %s42_s14, 1024  ;;  %p770_p2 = scmp.lt.s32.totalorder %s42_s14, %s42_s14 }
  0x27   :  { %p766_p1 = scmp.ne.s32.totalorder %s42_s14, %s765_s17  ;;  %p771_p3 = scmp.lt.s32.totalorder %s765_s17, %s765_s17 }
  0x29   :  { %p772_p4 = por %p771_p3, %p770_p2 }
  0x2b   :  { %p773_p5 = pnand %p772_p4, %p766_p1 }
  0x2d   :  { %776 = shalt.err (!%p773_p5)
}
  0x2e   :  { %47 = dma.hbm_to_vmem [thread:$0]  %s920_s2, 1024, %s42_s14, [#allocation6], %s850_s7, %s850_s7, %s851_s8  }
  0x2f   :  { %s785_s19 = scalar_lea.vmem %s66_s16, 2048  ;;  %p790_p7 = scmp.lt.s32.totalorder %s66_s16, %s66_s16 }
  0x30   :  { %p786_p6 = scmp.ne.s32.totalorder %s66_s16, %s785_s19  ;;  %p791_p8 = scmp.lt.s32.totalorder %s785_s19, %s785_s19 }
  0x32   :  { %p792_p9 = por %p791_p8, %p790_p7 }
  0x34   :  { %p793_p10 = pnand %p792_p9, %p786_p6 }
  0x36   :  { %796 = shalt.err (!%p793_p10)
}
  0x37   :  { %s854_s0 = smov 128   ;;  %s855_s20 = smov 8  }
  0x38   :  { %71 = dma.hbm_to_vmem [thread:$0]  %s922_s4, 2048, %s66_s16, [#allocation9], %s854_s0, %s854_s0, %s855_s20  }
  0x39   :  { %s856_s23 = smov [#allocation11]  }
  0x3a   :  { %s78_s24 = sshll.u32 %s856_s23, 4  ;;  %s79_s24 = int_to_ptr.vmem [resolvable:$true] %s78_s24 }
  0x3b   :  { %s805_s25 = scalar_lea.vmem %s79_s24, 256  ;;  %p810_p12 = scmp.lt.s32.totalorder %s79_s24, %s79_s24 }
  0x3c   :  { %p806_p11 = scmp.ne.s32.totalorder %s79_s24, %s805_s25  ;;  %p811_p13 = scmp.lt.s32.totalorder %s805_s25, %s805_s25 }
  0x3e   :  { %p812_p0 = por %p811_p13, %p810_p12 }
  0x40   :  { %p813_p1 = pnand %p812_p0, %p806_p11 }
  0x42   :  { %816 = shalt.err (!%p813_p1)
}
  0x43   :  { %81 = dma.hbm_to_vmem [thread:$0]  %s923_s5, 256, %s79_s24, [#allocation12]  }
  0x44   :  { %837 = dma.done.wait [#allocation3], 32  }
  0x45   :  { %838 = vsyncadd [#allocation3], 4294967264 }
  0x46   :  { %839 = dma.done.wait [#allocation6], 1056  }
  0x47   :  { %840 = vsyncadd [#allocation6], 4294966240 }
  0x48   :  { %841 = dma.done.wait [#allocation9], 3072  }
  0x49   :  { %842 = vsyncadd [#allocation9], 4294964224 }
  0x4a   :  { %843 = dma.done.wait [#allocation12], 256  }
  0x4b   :  { %844 = vsyncadd [#allocation12], 4294967040  ;;  %v857_v0 = vmov 0.0   ;;  %vm858_vm0 = vmmov 0   ;;  %v647_v1 = vld [vmem:[#allocation7 + $0x38] sm:$0xff]   ;;  %v648_v2 = vld [vmem:[#allocation7 + $0x30] sm:$0xff]   ;;  %v339_v52 = vlaneseq }
  0x4c   :  { %592 = vmatprep.subr.bf16.mxu0 %v857_v0  ;;  %608 = vmatprep.mubr.msk.bf16.mxu0 %vm858_vm0, %v857_v0  ;;  %v649_v3 = vld [vmem:[#allocation7 + $0x28] sm:$0xff]   ;;  %v655_v4 = vld [vmem:[#allocation8 + $0x38] sm:$0xff]   ;;  %v650_v5 = vld [vmem:[#allocation7 + $0x20] sm:$0xff]   ;;  %v859_v43 = vmov 0   ;;  %vm511_vm4 = vcmask 1041408   ;;  %s861_s4 = smov [#allocation13]  }
  0x4d   :  { %612 = vmatprep.subr.bf16.mxu1 %v857_v0  ;;  %628 = vmatprep.mubr.msk.bf16.mxu1 %vm858_vm0, %v857_v0  ;;  %v656_v6 = vld [vmem:[#allocation8 + $0x30] sm:$0xff]   ;;  %v651_v7 = vld [vmem:[#allocation7 + $0x18] sm:$0xff]   ;;  %v657_v8 = vld [vmem:[#allocation8 + $0x28] sm:$0xff]   ;;  %v340_v53 = vshrl.u32 %v339_v52, 7  ;;  %s529_s5 = sshll.u32 %s861_s4, 4  ;;  %s530_s5 = int_to_ptr.vmem [resolvable:$true] %s529_s5 }
  0x4e   :  { %593 = vmatpush3.bf16.msra.mxu0 %v647_v1  ;;  %613 = vmatpush3.bf16.msra.mxu1 %v655_v4  ;;  %v652_v9 = vld [vmem:[#allocation7 + $0x10] sm:$0xff]   ;;  %v658_v10 = vld [vmem:[#allocation8 + $0x20] sm:$0xff]   ;;  %v653_v11 = vld [vmem:[#allocation7 + $0x8] sm:$0xff]   ;;  %s817_s27 = scalar_lea.vmem %s530_s5, 96  ;;  %p822_p3 = scmp.lt.s32.totalorder %s530_s5, %s530_s5 }
  0x4f   :  { %594 = vmatprep.subr.bf16.mxu0 %v857_v0  ;;  %614 = vmatprep.subr.bf16.mxu1 %v857_v0  ;;  %v659_v12 = vld [vmem:[#allocation8 + $0x18] sm:$0xff]   ;;  %v654_v13 = vld [vmem:[#allocation7] sm:$0xff]   ;;  %v660_v15 = vld [vmem:[#allocation8 + $0x10] sm:$0xff]   ;;  %v341_v54 = vsub.s32 0, %v340_v53  ;;  %v345_v56 = vsub.s32 1, %v340_v53  ;;  %p818_p2 = scmp.ne.s32.totalorder %s530_s5, %s817_s27  ;;  %p823_p4 = scmp.lt.s32.totalorder %s817_s27, %s817_s27 }
  0x50   :  { %v107_v14 = vld [vmem:[#allocation2] sm:$0x3]  ;;  %v661_v17 = vld [vmem:[#allocation8 + $0x8] sm:$0xff]   ;;  %v662_v18 = vld [vmem:[#allocation8] sm:$0xff]  }
  0x51   :  { %v109_v16 = vpack.c.bf16 %v107_v14, %v107_v14  ;;  %v663_v19 = vld [vmem:[#allocation10 + $0x70] ss:$8 sps:$4 sm:$0xff]   ;;  %v665_v20 = vld [vmem:[#allocation10 + $0x74] ss:$8 sps:$4 sm:$0xff]   ;;  %v668_v21 = vld [vmem:[#allocation10 + $0x64] ss:$8 sps:$4 sm:$0xff]   ;;  %p824_p5 = por %p823_p4, %p822_p3 }
  0x52   :  { %595 = vmatpush3.bf16.msra.mxu0 %v648_v2  ;;  %615 = vmatpush3.bf16.msra.mxu1 %v656_v6  ;;  %v666_v22 = vld [vmem:[#allocation10 + $0x60] ss:$8 sps:$4 sm:$0xff]   ;;  %v671_v23 = vld [vmem:[#allocation10 + $0x54] ss:$8 sps:$4 sm:$0xff]   ;;  %v669_v24 = vld [vmem:[#allocation10 + $0x50] ss:$8 sps:$4 sm:$0xff]  }
  0x53   :  { %596 = vmatprep.subr.bf16.mxu0 %v857_v0  ;;  %616 = vmatprep.subr.bf16.mxu1 %v857_v0  ;;  %v674_v25 = vld [vmem:[#allocation10 + $0x44] ss:$8 sps:$4 sm:$0xff]   ;;  %v672_v26 = vld [vmem:[#allocation10 + $0x40] ss:$8 sps:$4 sm:$0xff]   ;;  %v677_v27 = vld [vmem:[#allocation10 + $0x34] ss:$8 sps:$4 sm:$0xff]   ;;  %p825_p6 = pnand %p824_p5, %p818_p2 }
  0x54   :  { %v675_v28 = vld [vmem:[#allocation10 + $0x30] ss:$8 sps:$4 sm:$0xff]   ;;  %v680_v29 = vld [vmem:[#allocation10 + $0x24] ss:$8 sps:$4 sm:$0xff]   ;;  %v678_v30 = vld [vmem:[#allocation10 + $0x20] ss:$8 sps:$4 sm:$0xff]  }
  0x55   :  { %v683_v31 = vld [vmem:[#allocation10 + $0x14] ss:$8 sps:$4 sm:$0xff]   ;;  %v681_v32 = vld [vmem:[#allocation10 + $0x10] ss:$8 sps:$4 sm:$0xff]   ;;  %v101_v33 = vld [vmem:[#allocation11] ss:$0 sm:$0xff] }
  0x56   :  { %597 = vmatpush3.bf16.msra.mxu0 %v649_v3  ;;  %617 = vmatpush3.bf16.msra.mxu1 %v657_v8  ;;  %v686_v41 = vld [vmem:[#allocation10 + $0x4] ss:$8 sps:$4 sm:$0xff]   ;;  %v684_v42 = vld [vmem:[#allocation10] ss:$8 sps:$4 sm:$0xff]  }
  0x57   :  { %598 = vmatprep.subr.bf16.mxu0 %v857_v0  ;;  %618 = vmatprep.subr.bf16.mxu1 %v857_v0  ;;  %v102_v44 = vld [vmem:[#allocation11 + $0x1] ss:$0 sm:$0xff]  ;;  %v104_v55 = vld [vmem:[#allocation11 + $0x2] ss:$8 sm:$0x3] }
  0x58   :  { %v342_v57 = vrot.slane %v104_v55, %v341_v54  ;;  %v346_v58 = vrot.slane %v104_v55, %v345_v56  ;;  %v105_v4 = vld [vmem:[#allocation11 + $0x3] ss:$0 sm:$0xff]  ;;  %v106_v6 = vld [vmem:[#allocation11 + $0x4] ss:$0 sm:$0xff] }
  0x5a   :  { %599 = vmatpush3.bf16.msra.mxu0 %v650_v5  ;;  %619 = vmatpush3.bf16.msra.mxu1 %v658_v10  ;;  %v108_v10 = vld [vmem:[#allocation5] sm:$0x3] }
  0x5b   :  { %600 = vmatprep.subr.bf16.mxu0 %v857_v0  ;;  %620 = vmatprep.subr.bf16.mxu1 %v857_v0 }
  0x5e   :  { %601 = vmatpush3.bf16.msra.mxu0 %v651_v7  ;;  %621 = vmatpush3.bf16.msra.mxu1 %v659_v12 }
  0x5f   :  { %602 = vmatprep.subr.bf16.mxu0 %v857_v0  ;;  %622 = vmatprep.subr.bf16.mxu1 %v857_v0 }
  0x62   :  { %603 = vmatpush3.bf16.msra.mxu0 %v652_v9  ;;  %623 = vmatpush3.bf16.msra.mxu1 %v660_v15 }
  0x63   :  { %604 = vmatprep.subr.bf16.mxu0 %v857_v0  ;;  %624 = vmatprep.subr.bf16.mxu1 %v857_v0 }
  0x66   :  { %605 = vmatpush3.bf16.msra.mxu0 %v653_v11  ;;  %625 = vmatpush3.bf16.msra.mxu1 %v661_v17 }
  0x67   :  { %606 = vmatprep.subr.bf16.mxu0 %v857_v0  ;;  %626 = vmatprep.subr.bf16.mxu1 %v857_v0 }
  0x6a   :  { %607 = vmatpush3.bf16.msra.mxu0 %v654_v13  ;;  %627 = vmatpush3.bf16.msra.mxu1 %v662_v18 }
  0x6b   :  { %429 = vmatprep.subr.bf16.mxu0 %v665_v20 }
  0x6d   :  { %609 = vmatmul.mubr.bf16.vlgmr.msra.gmra.mxu0 %v109_v16 }
  0x6e   :  { %430 = vmatpush1.bf16.msra.mxu0 %v663_v19  ;;  %461 = vmatprep.mubr.bf16.mxu0 %v859_v43  ;;  %v499_v19 = vmul.f32 -0.5, %v108_v10 }
  0x6f   :  { %431 = vmatprep.subr.bf16.mxu0 %v668_v21 }
  0x72   :  { %432 = vmatpush1.bf16.msra.mxu0 %v666_v22 }
  0x73   :  { %433 = vmatprep.subr.bf16.mxu0 %v671_v23 }
  0x76   :  { %434 = vmatpush1.bf16.msra.mxu0 %v669_v24  ;;  %v860_v24 = vmov -1.0  }
  0x77   :  { %435 = vmatprep.subr.bf16.mxu0 %v674_v25 }
  0x7a   :  { %436 = vmatpush1.bf16.msra.mxu0 %v672_v26 }
  0x7b   :  { %437 = vmatprep.subr.bf16.mxu0 %v677_v27  ;;  %v500_v27 = vmul.f32 %v499_v19, %v108_v10 }
  0x7e   :  { %438 = vmatpush1.bf16.msra.mxu0 %v675_v28 }
  0x7f   :  { %439 = vmatprep.subr.bf16.mxu0 %v680_v29 }
  0x82   :  { %440 = vmatpush1.bf16.msra.mxu0 %v678_v30 }
  0x83   :  { %441 = vmatprep.subr.bf16.mxu0 %v683_v31 }
  0x86   :  { %442 = vmatpush1.bf16.msra.mxu0 %v681_v32 }
  0x87   :  { %443 = vmatprep.subr.bf16.mxu0 %v686_v41 }
  0x8a   :  { %444 = vmatpush1.bf16.msra.mxu0 %v684_v42 }
 0x12d   :  { %v208_v34 = vpop.f32.mrf.mxu0 }
 0x12e   :  { %v209_v35 = vadd.f32 %v208_v34, %v101_v33 }
 0x12f   :  { %v610_v36 = vpop.f32.mrf.mxu0 }
 0x130   :  { %v214_v37 = vmax.f32 %v209_v35, 0.0 }
 0x131   :  { %v211_v38 = vpop.f32.mrf.mxu0 }
 0x132   :  { %v215_v39 = vpack.c.bf16 %v214_v37, %v214_v37 }
 0x133   :  { %v611_v40 = vpop.f32.mrf.mxu0 }
 0x134   :  { %629 = vmatmul.mubr.bf16.vlgmr.msra.gmra.mxu1 %v215_v39  ;;  %v508_v39 = vand.u32 127, %v339_v52 }
 0x136   :  { %vm509_vm3 = vcmp.lt.s32.totalorder %v508_v39, 4 }
 0x1f4   :  { %v314_v45 = vpop.f32.mrf.mxu1 }
 0x1f5   :  { %v315_v46 = vadd.f32 %v314_v45, %v102_v44 }
 0x1f6   :  { %v630_v47 = vpop.f32.mrf.mxu1 }
 0x1f7   :  { %v320_v48 = vmax.f32 %v315_v46, 0.0 }
 0x1f8   :  { %v317_v49 = vpop.f32.mrf.mxu1 }
 0x1f9   :  { %v321_v50 = vpack.c.bf16 %v320_v48, %v320_v48 }
 0x1fa   :  { %v631_v51 = vpop.f32.mrf.mxu1 }
 0x1fb   :  { %462 = vmatmul.mubr.bf16.vlgmr.msra.gmra.mxu0 %v321_v50 }
 0x2bb   :  { %v463_v59 = vpop.f32.mrf.mxu0 }
 0x2bc   :  { %v464_v60 = vadd.f32 %v463_v59, %v342_v57 }
 0x2bd   :  { %v465_v61 = vpop.f32.mrf.mxu0 }
 0x2be   :  { %687 = vtanh.f32 %v464_v60  ;;  %v466_v62 = vadd.f32 %v465_v61, %v346_v58 }
 0x2bf   :  { %v467_v63 = vpop.f32.mrf.mxu0 }
 0x2c0   :  { %v470_v0 = vmax.f32 %v466_v62, -20.0 }
 0x2c1   :  { %v468_v1 = vpop.f32.mrf.mxu0 }
 0x2c2   :  { %v471_v2 = vmin.f32 %v470_v0, 2.0 }
 0x2c4   :  { %v472_v3 = vmul.f32 1.442695, %v471_v2  ;;  %v501_v35 = vsub.f32 %v500_v27, %v471_v2 }
 0x2c6   :  { %689 = vpow2.f32 %v472_v3  ;;  %v573_v42 = vadd.f32 -0.9189385, %v501_v35 }
 0x2cb   :  { %v688_v5 = vpop.eup %687 }
 0x2cc   :  { %v519_v7 = vmul.f32 %v688_v5, %v105_v4 }
 0x2ce   :  { %v520_v8 = vadd.f32 %v519_v7, %v106_v6 }
 0x2d0   :  { %521 = vst [vmem:[#allocation13 + $0x2] sm:$0x3] %v520_v8 }
 0x2d3   :  { %v690_v9 = vpop.eup %689 }
 0x2d4   :  { %v474_v11 = vmul.f32 %v690_v9, %v108_v10 }
 0x2d6   :  { %v475_v12 = vadd.f32 %v474_v11, %v464_v60 }
 0x2d8   :  { %v476_v13 = vand.u32 2147483647, %v475_v12  ;;  %vm492_vm1 = vcmp.ge.f32.partialorder %v475_v12, 0.0  ;;  %v489_v23 = vmul.f32 -2.0, %v475_v12  ;;  %v503_v37 = vsub.f32 0.6931472, %v475_v12 }
 0x2d9   :  { %v493_v25 = vsel %vm492_vm1, 1.0, %v860_v24 }
 0x2da   :  { %v477_v14 = vmul.f32 -2.0, %v476_v13  ;;  %v490_v32 = vmax.f32 %v489_v23, 0.0 }
 0x2dc   :  { %v478_v15 = vmul.f32 1.442695, %v477_v14 }
 0x2de   :  { %691 = vpow2.f32 %v478_v15 }
 0x2eb   :  { %v692_v16 = vpop.eup %691 }
 0x2ec   :  { %v480_v17 = vadd.f32 1.0, %v692_v16  ;;  %v483_v18 = vmul.f32 -0.5, %v692_v16  ;;  %v494_v20 = vsub.f32 1.0, %v692_v16  ;;  %v486_v22 = vand.u32 2147483647, %v692_v16 }
 0x2ee   :  { %693 = vlog2.f32 %v480_v17  ;;  %v484_v21 = vadd.f32 1.0, %v483_v18  ;;  %v495_v28 = vmul.f32 %v494_v20, %v493_v25  ;;  %vm487_vm2 = vcmp.lt.f32.partialorder %v486_v22, 0.0004427343 }
 0x2ef   :  { %695 = vrcp.f32 %v480_v17 }
 0x2f0   :  { %v485_v31 = vmul.f32 %v692_v16, %v484_v21 }
 0x2fb   :  { %v694_v26 = vpop.eup %693 }
 0x2fc   :  { %v696_v29 = vpop.eup %695  ;;  %v482_v30 = vmul.f32 0.6931472, %v694_v26 }
 0x2fd   :  { %v498_v33 = vmul.f32 %v696_v29, %v495_v28 }
 0x2fe   :  { %v488_v34 = vsel %vm487_vm2, %v485_v31, %v482_v30 }
 0x2ff   :  { %v491_v36 = vadd.f32 %v490_v32, %v488_v34  ;;  %v515_v38 = vmul.f32 %v498_v33, %v105_v4 }
 0x301   :  { %v504_v40 = vsub.f32 %v503_v37, %v491_v36  ;;  %v516_v41 = vadd.f32 %v515_v38, %v106_v6 }
 0x303   :  { %v505_v43 = vmul.f32 2.0, %v504_v40  ;;  %517 = vst [vmem:[#allocation13] sm:$0x3] %v516_v41 }
 0x305   :  { %v506_v44 = vsub.f32 %v573_v42, %v505_v43 }
 0x307   :  { %v510_v45 = vsel %vm509_vm3, %v506_v44, 0.0 }
 0x308   :  { %v512_v46 = vsel %vm511_vm4, %v510_v45, 0.0 }
 0x309   :  { %513 = vadd.xlane.f32.xlu0 %v512_v46 }
 0x392   :  { %v514_v47 = vpop.xlane.xlu0 %513 }
 0x393   :  { %522 = vst [vmem:[#allocation13 + $0x4] sm:$0x3] %v514_v47 }
 0x394   :  { %828 = shalt.err (!%p825_p6)
}
 0x395   :  { %532 = dma.vmem_to_hbm [thread:$0]  %s530_s5, 96, %s924_s6, [#allocation4]  }
 0x396   :  { %845 = dma.done.wait [#allocation4], 96  }
 0x397   :  { %846 = vsyncadd [#allocation4], 4294967200 }
 0x398   :  { %536 = vsyncpa [#allocation3], 1 }
 0x399   :  { %537 = vsyncpa [#allocation6], 1 }
 0x39a   :  { %538 = vsyncpa [#allocation9], 1 }
 0x39b   :  { %539 = vsyncpa [#allocation12], 1 }
 0x39c   :  { %540 = vsyncpa [#allocation4], 1 }

</bundles_post_ra>
